<compile_context>
chip_gen: v6e
topology: v6e:2x2x1
jax: 0.10.0
libtpu: 0.0.40
codegen_flags: <defaults>
</compile_context>

<pallas_src>
import jax
import jax.numpy as jnp
from jax import lax
from jax.experimental import pallas as pl
from jax.experimental.pallas import tpu as pltpu


_SUBLANE = 8  # f32 sublane count; keeps batch chunks / s1-s2 split tile aligned


# ------------------------- in-kernel compute ------------------------- #

def _pool_chunk(tok, fused, bias, groups):
    """tok: (G*L, 1) int32, fused: (V, H) f32 = embedding @ W.T, bias: (1, H).

    Returns (G, H): one-hot gather through the pre-fused table (single MXU
    matmul), max over each length-L group, then bias (exact: max(x+b)=max(x)+b
    and the padding_idx=0 row of `fused` is exactly zero)."""
    n = tok.shape[0]
    v, h = fused.shape
    ids = lax.broadcasted_iota(jnp.int32, (n, v), 1)
    one_hot = (tok == ids).astype(fused.dtype)
    z = jnp.dot(one_hot, fused, preferred_element_type=jnp.float32)   # (N, H)
    seq = n // groups
    # With L == 8 this reshape splits the sublane axis at a vreg boundary.
    return jnp.max(z.reshape(groups, seq, h), axis=1) + bias          # (G, H)


def _encoder_kernel(tok_ref, fused_ref, b_ref, out_ref):
    bg = out_ref.shape[0]
    out_ref[...] = _pool_chunk(tok_ref[...], fused_ref[...], b_ref[...],
                               bg).astype(out_ref.dtype)


def _distance_kernel(tok_ref, fused_ref, b_ref, dist_ref, vec_ref):
    bg = dist_ref.shape[2]
    # One fused encode of this chunk's s1 rows (first bg groups) and s2 rows
    # (last bg groups); the split is sublane-tile aligned because bg % 8 == 0.
    pooled = _pool_chunk(tok_ref[...], fused_ref[...], b_ref[...], 2 * bg)  # (2BG, H)
    vec_ref[...] = pooled.astype(vec_ref.dtype)
    v1 = pooled[:bg]
    v2 = pooled[bg:]
    # torch.nn.functional.normalize: x / max(||x||, eps);
    # 1 / max(||x||, eps) == rsqrt(max(||x||^2, eps^2))  (EUP rsqrt, no divide).
    eps2 = 1e-12 * 1e-12
    inv1 = lax.rsqrt(jnp.maximum(jnp.sum(v1 * v1, axis=-1, keepdims=True), eps2))
    inv2 = lax.rsqrt(jnp.maximum(jnp.sum(v2 * v2, axis=-1, keepdims=True), eps2))
    p = (v1 * inv1) * (v2 * inv2)                                     # (BG, H)
    # Lane-dense cosine: contract H of a ones row against H of p (NT matmul on
    # the MXU) -> (1, BG) with the batch on the lane axis; no masked column store.
    ones_h = jnp.ones((1, p.shape[1]), jnp.float32)
    cos = lax.dot_general(ones_h, p, (((1,), (1,)), ((), ())),
                          preferred_element_type=jnp.float32)         # (1, BG)
    dist_ref[...] = (1.0 - cos)[None].astype(dist_ref.dtype)          # (1, 1, BG)


# ------------------------- pallas_call wrappers ------------------------- #

def _compiler_params():
    # Explicit scoped-VMEM limit (v5e defaults to 16 MiB); chunks are independent
    # so the grid axis is "parallel" (v7x: split across the two TensorCores).
    return pltpu.CompilerParams(dimension_semantics=("parallel",),
                                vmem_limit_bytes=32 * 1024 * 1024)


def _encoder_call(tok_rows, fused, bias, batch_pad, bg, seq):
    """tok_rows: (batch_pad * seq, 1) int32; returns (batch_pad, H) f32."""
    v, h = fused.shape
    n_chunks = batch_pad // bg
    rows = bg * seq
    return pl.pallas_call(
        _encoder_kernel,
        out_shape=jax.ShapeDtypeStruct((batch_pad, h), jnp.float32),
        grid=(n_chunks,),
        in_specs=[pl.BlockSpec((rows, 1), lambda i: (i, 0)),
                  pl.BlockSpec((v, h), lambda i: (0, 0)),
                  pl.BlockSpec((1, h), lambda i: (0, 0))],
        out_specs=pl.BlockSpec((bg, h), lambda i: (i, 0)),
        compiler_params=_compiler_params(),
    )(tok_rows, fused, bias)


def _distance_call(tok_rows, fused, bias, batch_pad, bg, seq):
    """tok_rows: (n_chunks * 2*bg*seq, 1) int32, per chunk: bg*seq s1 rows then
    bg*seq s2 rows.  Returns (dist (n_chunks,1,bg), pooled (2*batch_pad, H))."""
    v, h = fused.shape
    n_chunks = batch_pad // bg
    rows = 2 * bg * seq
    return pl.pallas_call(
        _distance_kernel,
        out_shape=(jax.ShapeDtypeStruct((n_chunks, 1, bg), jnp.float32),
                   jax.ShapeDtypeStruct((2 * batch_pad, h), jnp.float32)),
        grid=(n_chunks,),
        in_specs=[pl.BlockSpec((rows, 1), lambda i: (i, 0)),
                  pl.BlockSpec((v, h), lambda i: (0, 0)),
                  pl.BlockSpec((1, h), lambda i: (0, 0))],
        out_specs=(pl.BlockSpec((1, 1, bg), lambda i: (i, 0, 0)),
                   pl.BlockSpec((2 * bg, h), lambda i: (i, 0))),
        compiler_params=_compiler_params(),
    )(tok_rows, fused, bias)


# ------------------------- module wrapper ------------------------- #

class SiameseNetworkPallas:
    def __init__(self, config, key, batch_group=_SUBLANE):
        hidden = config["hidden_size"]
        vocab = config["vocab_size"] + 1
        assert batch_group % _SUBLANE == 0
        self.hidden = hidden
        self.vocab = vocab
        self.batch_group = batch_group
        k_emb, k_w, k_b = jax.random.split(key, 3)
        emb = jax.random.normal(k_emb, (vocab, hidden), jnp.float32) * 0.02
        self.embedding = emb.at[0].set(0.0)                 # padding_idx=0 row is zero
        # nn.Linear(hidden, hidden): weight (out, in), y = x @ W.T + b
        weight = jax.random.normal(k_w, (hidden, hidden), jnp.float32) * (hidden ** -0.5)
        self.w_t = weight.T                                 # (H_in, H_out)
        self.bias = jax.random.normal(k_b, (1, hidden), jnp.float32) * 0.01
        # Pre-fused embedding->Linear table: one (rows, V) @ (V, H) matmul per
        # kernel step.  Row 0 stays exactly zero, so bias-after-max is exact.
        self.table_fused = self.embedding @ self.w_t        # (V, H)
        # Dropout(0.5) is identity in eval mode.

    # -- helpers ------------------------------------------------------- #
    def _pad_batch(self, tokens):
        b, l = tokens.shape
        bg = self.batch_group
        b_pad = ((b + bg - 1) // bg) * bg
        if b_pad != b:
            pad = jnp.zeros((b_pad - b, l), tokens.dtype)   # padding token id 0
            tokens = jnp.concatenate([tokens, pad], axis=0)
        return tokens, b_pad

    # -- encoder-only path (forward(s1)) ------------------------------- #
    def encode(self, tokens):
        b, l = tokens.shape
        tok_p, b_pad = self._pad_batch(tokens.astype(jnp.int32))
        tok_rows = tok_p.reshape(b_pad * l, 1)
        out = _encoder_call(tok_rows, self.table_fused, self.bias,
                            b_pad, self.batch_group, l)
        return out[:b]

    # -- fused encode + distance path (forward(s1, s2)) ---------------- #
    def _distance(self, s1, s2):
        b, l = s1.shape
        s1p, b_pad = self._pad_batch(s1.astype(jnp.int32))
        s2p, _ = self._pad_batch(s2.astype(jnp.int32))
        bg = self.batch_group
        n_chunks = b_pad // bg
        # Per chunk: bg rows of s1 tokens then bg rows of s2 tokens (tiny int op).
        tok = jnp.concatenate([s1p.reshape(n_chunks, bg, l),
                               s2p.reshape(n_chunks, bg, l)], axis=1)
        tok_rows = tok.reshape(n_chunks * 2 * bg * l, 1)
        dist, pooled = _distance_call(tok_rows, self.table_fused, self.bias,
                                      b_pad, bg, l)
        return dist, pooled, b, b_pad

    def __call__(self, sentence1, sentence2=None):
        if sentence2 is None:
            return self.encode(sentence1)
        dist, _pooled, b, _ = self._distance(sentence1, sentence2)
        return dist.reshape(-1)[:b]                         # (B,), matches torch

    def distance_and_vectors(self, sentence1, sentence2):
        """Single pallas_call returning both the distance and the two encoded
        sentence vectors (review: avoid a second launch + table re-DMA)."""
        dist, pooled, b, b_pad = self._distance(sentence1, sentence2)
        bg = self.batch_group
        pooled = pooled.reshape(b_pad // bg, 2, bg, self.hidden)
        v1 = pooled[:, 0].reshape(b_pad, self.hidden)[:b]
        v2 = pooled[:, 1].reshape(b_pad, self.hidden)[:b]
        return dist.reshape(-1)[:b], v1, v2

    # TODO(synk): CosineEmbeddingLoss / cosine_triplet_loss training branches
    # (boolean-masked mean) are loss glue, not the kernel hot path; omitted.


# ------------------------- pure-JAX reference ------------------------- #

def _reference_encode(net, tok):
    e = jnp.take(net.embedding, tok, axis=0)                # (B, L, H)
    y = e @ net.w_t + net.bias
    return jnp.max(y, axis=1)


def _reference_distance(net, s1, s2):
    v1, v2 = _reference_encode(net, s1), _reference_encode(net, s2)
    n1 = v1 / jnp.maximum(jnp.linalg.norm(v1, axis=-1, keepdims=True), 1e-12)
    n2 = v2 / jnp.maximum(jnp.linalg.norm(v2, axis=-1, keepdims=True), 1e-12)
    return 1.0 - jnp.sum(n1 * n2, axis=-1)


if __name__ == "__main__":
    config = {"hidden_size": 32, "vocab_size": 16, "max_length": 8}
    B, L = 2, config["max_length"]

    key = jax.random.PRNGKey(0)
    k_net, k_s1, k_s2 = jax.random.split(key, 3)
    net = SiameseNetworkPallas(config, k_net)

    sentence1 = jax.random.randint(k_s1, (B, L), 0, config["vocab_size"] + 1, jnp.int32)
    sentence2 = jax.random.randint(k_s2, (B, L), 0, config["vocab_size"] + 1, jnp.int32)

    dist = jax.block_until_ready(net(sentence1, sentence2))   # siamese distance path
    vec = jax.block_until_ready(net(sentence1))               # encoder-only path
    d2, v1, v2 = net.distance_and_vectors(sentence1, sentence2)
    jax.block_until_ready((d2, v1, v2))                       # fused dist + vectors

    assert dist.shape == (B,)
    assert vec.shape == (B, config["hidden_size"])

    ref_dist = _reference_distance(net, sentence1, sentence2)
    ref_v1 = _reference_encode(net, sentence1)
    ref_v2 = _reference_encode(net, sentence2)
    assert jnp.allclose(dist, ref_dist, atol=1e-5), (dist, ref_dist)
    assert jnp.allclose(vec, ref_v1, atol=1e-5), (vec, ref_v1)
    assert jnp.allclose(d2, ref_dist, atol=1e-5), (d2, ref_dist)
    assert jnp.allclose(v1, ref_v1, atol=1e-5), (v1, ref_v1)
    assert jnp.allclose(v2, ref_v2, atol=1e-5), (v2, ref_v2)

    print("KERNEL_OK")
</pallas_src>

<mosaic_0001>
module attributes {stable_mosaic.version = 11 : i64} {
  func.func @_distance_kernel(%arg0: i32, %arg1: memref<128x1xi32, #tpu.memory_space<vmem>>, %arg2: memref<17x32xf32, #tpu.memory_space<vmem>>, %arg3: memref<1x32xf32, #tpu.memory_space<vmem>>, %arg4: memref<1x1x8xf32, #tpu.memory_space<vmem>>, %arg5: memref<16x32xf32, #tpu.memory_space<vmem>>) attributes {dimension_semantics = [#tpu.dimension_semantics<parallel>], iteration_bounds = array<i64: 1>, scalar_prefetch = 0 : i64, scratch_operands = 0 : i64, tpu.core_type = #tpu.core_type<tc>, window_params = [{transform_indices = @transform_0, window_bounds = array<i64: 128, 1>}, {pipeline_mode = #tpu.pipeline_mode<synchronous>, transform_indices = @transform_1, window_bounds = array<i64: 17, 32>}, {pipeline_mode = #tpu.pipeline_mode<synchronous>, transform_indices = @transform_2, window_bounds = array<i64: 1, 32>}, {transform_indices = @transform_3, window_bounds = array<i64: 1, 1, 8>}, {transform_indices = @transform_4, window_bounds = array<i64: 16, 32>}]} {
    %c0 = arith.constant 0 : index
    %c0_0 = arith.constant 0 : index
    %0 = vector.load %arg1[%c0, %c0_0] : memref<128x1xi32, #tpu.memory_space<vmem>>, vector<128x1xi32>
    %c0_1 = arith.constant 0 : index
    %c0_2 = arith.constant 0 : index
    %1 = vector.load %arg2[%c0_1, %c0_2] : memref<17x32xf32, #tpu.memory_space<vmem>>, vector<17x32xf32>
    %c0_3 = arith.constant 0 : index
    %c0_4 = arith.constant 0 : index
    %2 = vector.load %arg3[%c0_3, %c0_4] : memref<1x32xf32, #tpu.memory_space<vmem>>, vector<1x32xf32>
    %3 = tpu.iota {dimensions = array<i32: 1>} : vector<128x17xi32>
    %4 = vector.broadcast %0 : vector<128x1xi32> to vector<128x17xi32>
    %5 = arith.cmpi eq, %4, %3 : vector<128x17xi32>
    %6 = arith.extui %5 : vector<128x17xi1> to vector<128x17xi32>
    %7 = arith.sitofp %6 : vector<128x17xi32> to vector<128x17xf32>
    %cst = arith.constant dense<0.000000e+00> : vector<128x32xf32>
    %8 = tpu.matmul %7, %1, %cst {dimension_numbers = #tpu.dot_dimension_numbers<[1], [0], [0], [1], [0, 0, 1, 1], [], []>} : vector<128x17xf32>, vector<17x32xf32>, vector<128x32xf32> -> vector<128x32xf32>
    %9 = vector.shape_cast %8 : vector<128x32xf32> to vector<16x8x32xf32>
    %cst_5 = arith.constant dense<0xFF800000> : vector<16x32xf32>
    %10 = vector.multi_reduction <maximumf>, %9, %cst_5 [1] : vector<16x8x32xf32> to vector<16x32xf32>
    %11 = vector.broadcast %2 : vector<1x32xf32> to vector<16x32xf32>
    %12 = arith.addf %10, %11 : vector<16x32xf32>
    %c0_6 = arith.constant 0 : index
    %c0_7 = arith.constant 0 : index
    %13 = vector.load %arg5[%c0_6, %c0_7] : memref<16x32xf32, #tpu.memory_space<vmem>>, vector<16x32xf32>
    tpu.vector_store %arg5[%c0_6, %c0_7], %12 {strides = array<i32>} : memref<16x32xf32, #tpu.memory_space<vmem>>, vector<16x32xf32>,
    %14 = vector.extract_strided_slice %12 {offsets = [0, 0], sizes = [8, 32], strides = [1, 1]} : vector<16x32xf32> to vector<8x32xf32>
    %15 = vector.extract_strided_slice %12 {offsets = [8, 0], sizes = [8, 32], strides = [1, 1]} : vector<16x32xf32> to vector<8x32xf32>
    %16 = arith.mulf %14, %14 : vector<8x32xf32>
    %cst_8 = arith.constant dense<0.000000e+00> : vector<8xf32>
    %17 = vector.multi_reduction <add>, %16, %cst_8 [1] : vector<8x32xf32> to vector<8xf32>
    %18 = vector.shape_cast %17 : vector<8xf32> to vector<8x1xf32>
    %cst_9 = arith.constant 1.000000e-24 : f32
    %19 = vector.broadcast %cst_9 : f32 to vector<8x1xf32>
    %20 = arith.maximumf %18, %19 : vector<8x1xf32>
    %21 = math.rsqrt %20 : vector<8x1xf32>
    %22 = arith.mulf %15, %15 : vector<8x32xf32>
    %cst_10 = arith.constant dense<0.000000e+00> : vector<8xf32>
    %23 = vector.multi_reduction <add>, %22, %cst_10 [1] : vector<8x32xf32> to vector<8xf32>
    %24 = vector.shape_cast %23 : vector<8xf32> to vector<8x1xf32>
    %cst_11 = arith.constant 1.000000e-24 : f32
    %25 = vector.broadcast %cst_11 : f32 to vector<8x1xf32>
    %26 = arith.maximumf %24, %25 : vector<8x1xf32>
    %27 = math.rsqrt %26 : vector<8x1xf32>
    %28 = vector.broadcast %21 : vector<8x1xf32> to vector<8x32xf32>
    %29 = arith.mulf %14, %28 : vector<8x32xf32>
    %30 = vector.broadcast %27 : vector<8x1xf32> to vector<8x32xf32>
    %31 = arith.mulf %15, %30 : vector<8x32xf32>
    %32 = arith.mulf %29, %31 : vector<8x32xf32>
    %cst_12 = arith.constant 1.000000e+00 : f32
    %33 = vector.broadcast %cst_12 : f32 to vector<1x32xf32>
    %cst_13 = arith.constant dense<0.000000e+00> : vector<1x8xf32>
    %34 = tpu.matmul %33, %32, %cst_13 {dimension_numbers = #tpu.dot_dimension_numbers<[1], [1], [0], [0], [0, 0, 1, 0], [], []>} : vector<1x32xf32>, vector<8x32xf32>, vector<1x8xf32> -> vector<1x8xf32>
    %cst_14 = arith.constant 1.000000e+00 : f32
    %35 = vector.broadcast %cst_14 : f32 to vector<1x8xf32>
    %36 = arith.subf %35, %34 : vector<1x8xf32>
    %37 = vector.shape_cast %36 : vector<1x8xf32> to vector<1x1x8xf32>
    %c0_15 = arith.constant 0 : index
    %c0_16 = arith.constant 0 : index
    %c0_17 = arith.constant 0 : index
    %38 = vector.load %arg4[%c0_15, %c0_16, %c0_17] : memref<1x1x8xf32, #tpu.memory_space<vmem>>, vector<1x1x8xf32>
    tpu.vector_store %arg4[%c0_15, %c0_16, %c0_17], %37 {strides = array<i32>} : memref<1x1x8xf32, #tpu.memory_space<vmem>>, vector<1x1x8xf32>,
    return
  }
  func.func @transform_0(%arg0: i32) -> (i32, i32) {
    %c0_i32 = arith.constant 0 : i32
    %c0_i32_0 = arith.constant 0 : i32
    return %arg0, %c0_i32 : i32, i32
  }
  func.func @transform_1(%arg0: i32) -> (i32, i32) {
    %c0_i32 = arith.constant 0 : i32
    %c0_i32_0 = arith.constant 0 : i32
    %c0_i32_1 = arith.constant 0 : i32
    return %c0_i32, %c0_i32_0 : i32, i32
  }
  func.func @transform_2(%arg0: i32) -> (i32, i32) {
    %c0_i32 = arith.constant 0 : i32
    %c0_i32_0 = arith.constant 0 : i32
    %c0_i32_1 = arith.constant 0 : i32
    return %c0_i32, %c0_i32_0 : i32, i32
  }
  func.func @transform_3(%arg0: i32) -> (i32, i32, i32) {
    %c0_i32 = arith.constant 0 : i32
    %c0_i32_0 = arith.constant 0 : i32
    %c0_i32_1 = arith.constant 0 : i32
    return %arg0, %c0_i32, %c0_i32_0 : i32, i32, i32
  }
  func.func @transform_4(%arg0: i32) -> (i32, i32) {
    %c0_i32 = arith.constant 0 : i32
    %c0_i32_0 = arith.constant 0 : i32
    return %arg0, %c0_i32 : i32, i32
  }
}

</mosaic_0001>

<bundles_post_ra>
// kernel: tpu_custom_call.1
= control target key start
LH: loop header
LB: loop body
LE: loop exit
PB: predicated region body
PF: predicated region fallthrough
CT: control target
= control target key end

     0   :  { %10 = vsyncpa [#allocation3], 0  ;;  %v938_v2 = vmov 0   ;;  %vm185_vm0 = vcmask 1040384   ;;  %s1303_s0 = inlined_call_operand.vmem [shape: s32[128,1], index: 0, kind: input, shape index: {}]   ;;  %s1304_s1 = inlined_call_operand.vmem [shape: f32[17,32], index: 1, kind: input, shape index: {}]   ;;  %s1305_s2 = inlined_call_operand.vmem [shape: f32[1,32], index: 2, kind: input, shape index: {}]   ;;  %s1306_s3 = inlined_call_operand.hbm [shape: f32[1,1,8], index: 3, kind: output, shape index: {0}]   ;;  %s1307_s4 = inlined_call_operand.hbm [shape: f32[16,32], index: 4, kind: output, shape index: {1}]  }
   0x1   :  { %v20_v0 = vld [vmem:[%s1303_s0 + $0x10] sm:$0xff]  ;;  %v18_v1 = vld [vmem:[%s1303_s0] sm:$0xff]  ;;  %889 = vset.pattern.permute.xlu1 %v938_v2  ;;  %888 = vset.pattern.permute.xlu0 %v938_v2  ;;  %v21_v3 = vld [vmem:[%s1303_s0 + $0x18] sm:$0xff] }
   0x2   :  { %47 = vperm.xlu1 %889, %v20_v0   ;;  %41 = vperm.xlu0 %888, %v18_v1   ;;  %v19_v4 = vld [vmem:[%s1303_s0 + $0x8] sm:$0xff]  ;;  %v36_v5 = vld [vmem:[%s1304_s1 + $0x10] sm:$0x1] }
   0x3   :  { %v35_v6 = vld [vmem:[%s1304_s1 + $0x8] sm:$0xff] }
   0x6   :  { %50 = vperm.xlu1 %889, %v21_v3   ;;  %44 = vperm.xlu0 %888, %v19_v4  }
   0x7   :  { %11 = vsyncpa [#allocation5], 0  ;;  %v23_v7 = vld [vmem:[%s1303_s0 + $0x28] sm:$0xff]  ;;  %v22_v8 = vld [vmem:[%s1303_s0 + $0x20] sm:$0xff]  ;;  %839 = vmatprep.subr.msk.mxu0 %vm185_vm0, %v36_v5  ;;  %874 = vmatprep.subr.msk.mxu1 %vm185_vm0, %v36_v5  ;;  %v939_v14 = vmov 0.0   ;;  %v38_v21 = vlaneseq  ;;  %vm136_vm1 = vcmask 138240  }
   0x8   :  { %840 = vmatpush3.msk.msra.mxu0 %vm185_vm0, %v36_v5  ;;  %877 = vmatpush3.msk.msra.mxu1 %vm185_vm0, %v36_v5  ;;  %v34_v9 = vld [vmem:[%s1304_s1] sm:$0xff]  ;;  %v24_v10 = vld [vmem:[%s1303_s0 + $0x30] sm:$0xff]  ;;  %v25_v12 = vld [vmem:[%s1303_s0 + $0x38] sm:$0xff] }
   0x9   :  { %841 = vmatprep.subr.mxu0 %v35_v6  ;;  %875 = vmatprep.subr.mxu1 %v35_v6  ;;  %v28_v11 = vld [vmem:[%s1303_s0 + $0x50] sm:$0xff]  ;;  %v29_v13 = vld [vmem:[%s1303_s0 + $0x58] sm:$0xff]  ;;  %v26_v15 = vld [vmem:[%s1303_s0 + $0x40] sm:$0xff]  ;;  %v1029_v22 = vand.u32 127, %v38_v21 }
   0xa   :  { %56 = vperm.xlu1 %889, %v23_v7   ;;  %53 = vperm.xlu0 %888, %v22_v8   ;;  %v30_v16 = vld [vmem:[%s1303_s0 + $0x60] sm:$0xff]  ;;  %v27_v17 = vld [vmem:[%s1303_s0 + $0x48] sm:$0xff]  ;;  %v33_v19 = vld [vmem:[%s1303_s0 + $0x78] sm:$0xff] }
   0xb   :  { %842 = vmatpush3.msra.mxu0 %v35_v6  ;;  %878 = vmatpush3.msra.mxu1 %v35_v6  ;;  %v31_v18 = vld [vmem:[%s1303_s0 + $0x68] sm:$0xff]  ;;  %v32_v20 = vld [vmem:[%s1303_s0 + $0x70] sm:$0xff] }
   0xc   :  { %843 = vmatprep.subr.mxu0 %v34_v9  ;;  %876 = vmatprep.subr.mxu1 %v34_v9 }
   0xd   :  { %844 = vmatpush3.msra.mxu0 %v34_v9  ;;  %879 = vmatpush3.msra.mxu1 %v34_v9 }
   0xe   :  { %59 = vperm.xlu1 %889, %v24_v10   ;;  %71 = vperm.xlu0 %888, %v28_v11  }
   0xf   :  { %869 = vmatprep.subr.mxu1 %v939_v14 }
  0x12   :  { %62 = vperm.xlu1 %889, %v25_v12   ;;  %74 = vperm.xlu0 %888, %v29_v13  }
  0x16   :  { %65 = vperm.xlu1 %889, %v26_v15   ;;  %77 = vperm.xlu0 %888, %v30_v16  }
  0x1a   :  { %68 = vperm.xlu1 %889, %v27_v17   ;;  %80 = vperm.xlu0 %888, %v31_v18   ;;  %v1087_v17 = vld [vmem:[%s1305_s2] ss:$0 sm:$0xff]  ;;  %s942_s2 = smov [#allocation4]  }
  0x1b   :  { %s767_s27 = sshll.u32 %s942_s2, 4  ;;  %s768_s27 = int_to_ptr.vmem [resolvable:$true] %s767_s27 }
  0x1c   :  { %s894_s28 = scalar_lea.vmem %s768_s27, 256  ;;  %p899_p1 = scmp.lt.s32.totalorder %s768_s27, %s768_s27 }
  0x1d   :  { %p895_p0 = scmp.ne.s32.totalorder %s768_s27, %s894_s28  ;;  %p900_p2 = scmp.lt.s32.totalorder %s894_s28, %s894_s28 }
  0x1e   :  { %86 = vperm.xlu1 %889, %v33_v19   ;;  %83 = vperm.xlu0 %888, %v32_v20  }
  0x1f   :  { %p901_p3 = por %p900_p2, %p899_p1 }
  0x21   :  { %p902_p4 = pnand %p901_p3, %p895_p0 }
  0x7d   :  { %v48_v23 = vpop.permute.xlu1 %47  ;;  %v42_v24 = vpop.permute.xlu0 %41 }
  0x7e   :  { %vm88_vm2 = vcmp.eq.s32.totalorder %v42_v24, %v1029_v22  ;;  %vm90_vm3 = vcmp.eq.s32.totalorder %v48_v23, %v1029_v22 }
  0x7f   :  { %v782_v25 = vsel %vm88_vm2, 1.0, %v939_v14  ;;  %v784_v29 = vsel %vm90_vm3, 1.0, %v939_v14  ;;  %vm334_vm3 = vcmask 261120  }
  0x80   :  { %845 = vmatprep.mubr.msk.f32.mxu0 %vm136_vm1, %v782_v25 }
  0x81   :  { %v51_v26 = vpop.permute.xlu1 %50  ;;  %v45_v27 = vpop.permute.xlu0 %44 }
  0x82   :  { %vm89_vm4 = vcmp.eq.s32.totalorder %v45_v27, %v1029_v22  ;;  %vm91_vm5 = vcmp.eq.s32.totalorder %v51_v26, %v1029_v22 }
  0x83   :  { %v783_v28 = vsel %vm89_vm4, 1.0, %v939_v14  ;;  %v785_v32 = vsel %vm91_vm5, 1.0, %v939_v14  ;;  %vm489_vm4 = vcmask 1042434   ;;  %vm492_vm5 = vcmask 1043459  }
  0x84   :  { %846 = vmatmul.mubr.msk.f32.vlgmr.msra.gmra.mxu0 %vm136_vm1, %v783_v28 }
  0x85   :  { %v57_v30 = vpop.permute.xlu1 %56  ;;  %848 = vmatprep.mubr.msk.f32.mxu0 %vm136_vm1, %v784_v29  ;;  %v54_v31 = vpop.permute.xlu0 %53 }
  0x86   :  { %vm92_vm6 = vcmp.eq.s32.totalorder %v54_v31, %v1029_v22  ;;  %vm93_vm7 = vcmp.eq.s32.totalorder %v57_v30, %v1029_v22 }
  0x87   :  { %v786_v33 = vsel %vm92_vm6, 1.0, %v939_v14  ;;  %v787_v36 = vsel %vm93_vm7, 1.0, %v939_v14  ;;  %vm495_vm6 = vcmask 1044484   ;;  %vm498_vm7 = vcmask 1045509  }
  0x88   :  { %849 = vmatmul.mubr.msk.f32.gmra.mxu0 %vm136_vm1, %v785_v32 }
  0x89   :  { %v60_v34 = vpop.permute.xlu1 %59  ;;  %851 = vmatprep.mubr.msk.f32.mxu0 %vm136_vm1, %v786_v33  ;;  %v72_v35 = vpop.permute.xlu0 %71 }
  0x8a   :  { %vm94_vm8 = vcmp.eq.s32.totalorder %v60_v34, %v1029_v22  ;;  %vm98_vm9 = vcmp.eq.s32.totalorder %v72_v35, %v1029_v22 }
  0x8b   :  { %v788_v37 = vsel %vm94_vm8, 1.0, %v939_v14  ;;  %v792_v38 = vsel %vm98_vm9, 1.0, %v939_v14  ;;  %vm501_vm8 = vcmask 1046534   ;;  %vm504_vm9 = vcmask 1047559  }
  0x8c   :  { %852 = vmatmul.mubr.msk.f32.gmra.mxu0 %vm136_vm1, %v787_v36  ;;  %860 = vmatprep.mubr.msk.f32.mxu1 %vm136_vm1, %v792_v38 }
  0x8d   :  { %v63_v39 = vpop.permute.xlu1 %62  ;;  %854 = vmatprep.mubr.msk.f32.mxu0 %vm136_vm1, %v788_v37  ;;  %v75_v40 = vpop.permute.xlu0 %74 }
  0x8e   :  { %vm95_vm10 = vcmp.eq.s32.totalorder %v63_v39, %v1029_v22  ;;  %vm99_vm11 = vcmp.eq.s32.totalorder %v75_v40, %v1029_v22 }
  0x8f   :  { %v789_v41 = vsel %vm95_vm10, 1.0, %v939_v14  ;;  %v793_v42 = vsel %vm99_vm11, 1.0, %v939_v14  ;;  %vm940_vm10 = vmmov 0  }
  0x90   :  { %855 = vmatmul.mubr.msk.f32.gmra.mxu0 %vm136_vm1, %v789_v41  ;;  %861 = vmatmul.mubr.msk.f32.vlgmr.msra.gmra.mxu1 %vm136_vm1, %v793_v42 }
  0x91   :  { %v66_v43 = vpop.permute.xlu1 %65  ;;  %v78_v44 = vpop.permute.xlu0 %77 }
  0x92   :  { %vm96_vm12 = vcmp.eq.s32.totalorder %v66_v43, %v1029_v22  ;;  %vm100_vm13 = vcmp.eq.s32.totalorder %v78_v44, %v1029_v22 }
  0x93   :  { %v790_v45 = vsel %vm96_vm12, 1.0, %v939_v14  ;;  %v794_v46 = vsel %vm100_vm13, 1.0, %v939_v14 }
  0x94   :  { %857 = vmatprep.mubr.msk.f32.mxu0 %vm136_vm1, %v790_v45  ;;  %863 = vmatprep.mubr.msk.f32.mxu1 %vm136_vm1, %v794_v46 }
  0x95   :  { %v69_v47 = vpop.permute.xlu1 %68  ;;  %v81_v48 = vpop.permute.xlu0 %80 }
  0x96   :  { %vm97_vm14 = vcmp.eq.s32.totalorder %v69_v47, %v1029_v22  ;;  %vm101_vm15 = vcmp.eq.s32.totalorder %v81_v48, %v1029_v22 }
  0x97   :  { %v791_v49 = vsel %vm97_vm14, 1.0, %v939_v14  ;;  %v795_v50 = vsel %vm101_vm15, 1.0, %v939_v14 }
  0x98   :  { %858 = vmatmul.mubr.msk.f32.gmra.mxu0 %vm136_vm1, %v791_v49  ;;  %864 = vmatmul.mubr.msk.f32.gmra.mxu1 %vm136_vm1, %v795_v50 }
  0x99   :  { %v87_v51 = vpop.permute.xlu1 %86  ;;  %v84_v52 = vpop.permute.xlu0 %83 }
  0x9a   :  { %vm103_vm0 = vcmp.eq.s32.totalorder %v87_v51, %v1029_v22  ;;  %vm102_vm2 = vcmp.eq.s32.totalorder %v84_v52, %v1029_v22 }
  0x9b   :  { %v797_v53 = vsel %vm103_vm0, 1.0, %v939_v14  ;;  %v796_v54 = vsel %vm102_vm2, 1.0, %v939_v14 }
  0x9c   :  { %866 = vmatprep.mubr.msk.f32.mxu1 %vm136_vm1, %v796_v54 }
  0x9d   :  { %867 = vmatmul.mubr.msk.f32.gmra.mxu1 %vm136_vm1, %v797_v53  ;;  %vm486_vm1 = vcmask 1041409  }
  0x9e   :  { %871 = vmatprep.mubr.msk.f32.mxu1 %vm940_vm10, %v939_v14 }
 0x144   :  { %v847_v55 = vpop.f32.mrf.mxu0 }
 0x145   :  { %v342_v56 = vsel %vm334_vm3, %v847_v55, -inf }
 0x146   :  { %v343_v57 = vrot.slane %v342_v56, 4  ;;  %v255_v58 = vpop.f32.mrf.mxu0 }
 0x147   :  { %v335_v59 = vsel %vm334_vm3, %v255_v58, -inf }
 0x148   :  { %v344_v60 = vmax.f32 %v342_v56, %v343_v57  ;;  %v336_v61 = vrot.slane %v335_v59, 4  ;;  %v850_v62 = vpop.f32.mrf.mxu0 }
 0x149   :  { %v356_v63 = vsel %vm334_vm3, %v850_v62, -inf }
 0x14a   :  { %v345_v0 = vrot.slane %v344_v60, 2  ;;  %v337_v1 = vmax.f32 %v335_v59, %v336_v61  ;;  %v357_v2 = vrot.slane %v356_v63, 4  ;;  %v265_v3 = vpop.f32.mrf.mxu0 }
 0x14b   :  { %v349_v4 = vsel %vm334_vm3, %v265_v3, -inf }
 0x14c   :  { %v346_v5 = vmax.f32 %v344_v60, %v345_v0  ;;  %v338_v6 = vrot.slane %v337_v1, 2  ;;  %v358_v7 = vmax.f32 %v356_v63, %v357_v2  ;;  %v350_v8 = vrot.slane %v349_v4, 4  ;;  %v853_v9 = vpop.f32.mrf.mxu0 }
 0x14d   :  { %v370_v10 = vsel %vm334_vm3, %v853_v9, -inf }
 0x14e   :  { %v347_v11 = vrot.slane %v346_v5, 1  ;;  %v339_v12 = vmax.f32 %v337_v1, %v338_v6  ;;  %v359_v13 = vrot.slane %v358_v7, 2  ;;  %v351_v15 = vmax.f32 %v349_v4, %v350_v8  ;;  %v275_v16 = vpop.f32.mrf.mxu0 }
 0x14f   :  { %v371_v18 = vrot.slane %v370_v10, 4  ;;  %v363_v19 = vsel %vm334_vm3, %v275_v16, -inf }
 0x150   :  { %v348_v20 = vmax.f32 %v346_v5, %v347_v11  ;;  %v340_v21 = vrot.slane %v339_v12, 1  ;;  %v360_v22 = vmax.f32 %v358_v7, %v359_v13  ;;  %v352_v23 = vrot.slane %v351_v15, 2  ;;  %v856_v24 = vpop.f32.mrf.mxu0  ;;  %v862_v25 = vpop.f32.mrf.mxu1 }
 0x151   :  { %v372_v26 = vmax.f32 %v370_v10, %v371_v18  ;;  %v364_v27 = vrot.slane %v363_v19, 4  ;;  %v384_v28 = vsel %vm334_vm3, %v856_v24, -inf  ;;  %v412_v29 = vsel %vm334_vm3, %v862_v25, -inf }
 0x152   :  { %v1093_v30 = vadd.f32 %v1087_v17, %v348_v20  ;;  %v341_v31 = vmax.f32 %v339_v12, %v340_v21  ;;  %v361_v32 = vrot.slane %v360_v22, 1  ;;  %v353_v33 = vmax.f32 %v351_v15, %v352_v23  ;;  %v285_v46 = vpop.f32.mrf.mxu0  ;;  %v305_v53 = vpop.f32.mrf.mxu1 }
 0x153   :  { %v373_v34 = vrot.slane %v372_v26, 2  ;;  %v365_v35 = vmax.f32 %v363_v19, %v364_v27  ;;  %v385_v36 = vrot.slane %v384_v28, 4  ;;  %v413_v37 = vrot.slane %v412_v29, 4 }
 0x154   :  { %v485_v38 = vrot.slane %v1093_v30, 7  ;;  %v1098_v39 = vmul.f32 %v1093_v30, %v1093_v30  ;;  %v1101_v40 = vadd.f32 %v1087_v17, %v341_v31  ;;  %v362_v41 = vmax.f32 %v360_v22, %v361_v32 }
 0x155   :  { %v354_v42 = vrot.slane %v353_v33, 1  ;;  %v374_v43 = vmax.f32 %v372_v26, %v373_v34  ;;  %v366_v44 = vrot.slane %v365_v35, 2  ;;  %v386_v45 = vmax.f32 %v384_v28, %v385_v36 }
 0x156   :  { %v540_v47 = vrot.slane %v1098_v39, 7  ;;  %v1105_v48 = vadd.f32 %v1087_v17, %v362_v41  ;;  %v487_v54 = vsel %vm486_vm1, %v485_v38, %v1101_v40  ;;  %v414_v56 = vmax.f32 %v412_v29, %v413_v37 }
 0x157   :  { %v355_v49 = vmax.f32 %v353_v33, %v354_v42  ;;  %v375_v50 = vrot.slane %v374_v43, 1  ;;  %v367_v51 = vmax.f32 %v365_v35, %v366_v44  ;;  %v387_v52 = vrot.slane %v386_v45, 2 }
 0x158   :  { %v1111_v55 = vmul.f32 %v1105_v48, %v1105_v48  ;;  %v377_v57 = vsel %vm334_vm3, %v285_v46, -inf  ;;  %v865_v62 = vpop.f32.mrf.mxu1  ;;  %v1119_v63 = vmul.f32 %v1101_v40, %v1101_v40  ;;  %v415_v0 = vrot.slane %v414_v56, 2  ;;  %v859_v3 = vpop.f32.mrf.mxu0 }
 0x159   :  { %v1115_v58 = vadd.f32 %v1087_v17, %v355_v49  ;;  %v376_v59 = vmax.f32 %v374_v43, %v375_v50  ;;  %v368_v60 = vrot.slane %v367_v51, 1  ;;  %v388_v61 = vmax.f32 %v386_v45, %v387_v52 }
 0x15a   :  { %v378_v1 = vrot.slane %v377_v57, 4  ;;  %v405_v2 = vsel %vm334_vm3, %v305_v53, -inf  ;;  %v491_v4 = vrot.slane %v1105_v48, 5  ;;  %v416_v9 = vmax.f32 %v414_v56, %v415_v0  ;;  %v315_v18 = vpop.f32.mrf.mxu1  ;;  %v295_v23 = vpop.f32.mrf.mxu0 }
 0x15b   :  { %v488_v5 = vrot.slane %v1115_v58, 6  ;;  %v1126_v6 = vmul.f32 %v1115_v58, %v1115_v58  ;;  %v369_v7 = vmax.f32 %v367_v51, %v368_v60  ;;  %v389_v8 = vrot.slane %v388_v61, 1 }
 0x15c   :  { %v379_v10 = vmax.f32 %v377_v57, %v378_v1  ;;  %v406_v11 = vrot.slane %v405_v2, 4  ;;  %v544_v12 = vrot.slane %v1111_v55, 5  ;;  %v1133_v15 = vadd.f32 %v1087_v17, %v376_v59 }
 0x15d   :  { %v1130_v13 = vsel %vm489_vm4, %v488_v5, %v487_v54  ;;  %v1136_v16 = vadd.f32 %v1087_v17, %v369_v7  ;;  %v390_v19 = vmax.f32 %v388_v61, %v389_v8  ;;  %v417_v20 = vrot.slane %v416_v9, 1  ;;  %v868_v37 = vpop.f32.mrf.mxu1 }
 0x15e   :  { %v380_v21 = vrot.slane %v379_v10, 2  ;;  %v407_v22 = vmax.f32 %v405_v2, %v406_v11  ;;  %v542_v24 = vrot.slane %v1126_v6, 6  ;;  %v398_v26 = vsel %vm334_vm3, %v859_v3, -inf }
 0x15f   :  { %v1141_v25 = vmul.f32 %v1136_v16, %v1136_v16  ;;  %v426_v27 = vsel %vm334_vm3, %v865_v62, -inf  ;;  %v1146_v28 = vadd.f32 %v1087_v17, %v390_v19  ;;  %v418_v29 = vmax.f32 %v416_v9, %v417_v20  ;;  %v325_v60 = vpop.f32.mrf.mxu1 }
 0x160   :  { %v381_v31 = vmax.f32 %v379_v10, %v380_v21  ;;  %v408_v32 = vrot.slane %v407_v22, 2  ;;  %v497_v33 = vrot.slane %v1133_v15, 3  ;;  %v399_v34 = vrot.slane %v398_v26, 4 }
 0x161   :  { %v427_v35 = vrot.slane %v426_v27, 4  ;;  %v391_v36 = vsel %vm334_vm3, %v295_v23, -inf  ;;  %v494_v38 = vrot.slane %v1136_v16, 4  ;;  %v1152_v41 = vadd.f32 %v1087_v17, %v418_v29 }
 0x162   :  { %v382_v42 = vrot.slane %v381_v31, 1  ;;  %v409_v43 = vmax.f32 %v407_v22, %v408_v32  ;;  %v400_v44 = vmax.f32 %v398_v26, %v399_v34  ;;  %v392_v46 = vrot.slane %v391_v36, 4 }
 0x163   :  { %v428_v45 = vmax.f32 %v426_v27, %v427_v35  ;;  %v419_v49 = vsel %vm334_vm3, %v315_v18, -inf  ;;  %v546_v50 = vrot.slane %v1141_v25, 4  ;;  %v503_v51 = vrot.slane %v1146_v28, 1 }
 0x164   :  { %v383_v52 = vmax.f32 %v381_v31, %v382_v42  ;;  %v410_v53 = vrot.slane %v409_v43, 1  ;;  %v401_v54 = vrot.slane %v400_v44, 2  ;;  %v393_v57 = vmax.f32 %v391_v36, %v392_v46 }
 0x165   :  { %v429_v56 = vrot.slane %v428_v45, 2  ;;  %v420_v59 = vrot.slane %v419_v49, 4  ;;  %v510_v61 = vrot.slane %v1152_v41, 5  ;;  %v1160_v62 = vmul.f32 %v1152_v41, %v1152_v41 }
 0x166   :  { %v411_v0 = vmax.f32 %v409_v43, %v410_v53  ;;  %v440_v1 = vsel %vm334_vm3, %v868_v37, -inf  ;;  %v402_v2 = vmax.f32 %v400_v44, %v401_v54  ;;  %v394_v5 = vrot.slane %v393_v57, 2 }
 0x167   :  { %v430_v3 = vmax.f32 %v428_v45, %v429_v56  ;;  %v421_v7 = vmax.f32 %v419_v49, %v420_v59  ;;  %v1164_v8 = vadd.f32 %v1087_v17, %v383_v52  ;;  %v441_v10 = vrot.slane %v440_v1, 4 }
 0x168   :  { %v1167_v9 = vadd.f32 %v1087_v17, %v411_v0  ;;  %v433_v11 = vsel %vm334_vm3, %v325_v60, -inf  ;;  %v403_v18 = vrot.slane %v402_v2, 1  ;;  %v395_v20 = vmax.f32 %v393_v57, %v394_v5 }
 0x169   :  { %v431_v19 = vrot.slane %v430_v3, 1  ;;  %v422_v21 = vrot.slane %v421_v7, 2  ;;  %v580_v22 = vrot.slane %v1160_v62, 5  ;;  %v442_v26 = vmax.f32 %v440_v1, %v441_v10 }
 0x16a   :  { %v562_v23 = vmul.f32 %v1167_v9, %v1167_v9  ;;  %v434_v27 = vrot.slane %v433_v11, 4  ;;  %v404_v29 = vmax.f32 %v402_v2, %v403_v18  ;;  %v396_v32 = vrot.slane %v395_v20, 1 }
 0x16b   :  { %v432_v31 = vmax.f32 %v430_v3, %v431_v19  ;;  %v423_v34 = vmax.f32 %v421_v7, %v422_v21  ;;  %v500_v35 = vrot.slane %v1164_v8, 2  ;;  %v508_v36 = vrot.slane %v1167_v9, 6 }
 0x16c   :  { %v443_v37 = vrot.slane %v442_v26, 2  ;;  %v435_v42 = vmax.f32 %v433_v11, %v434_v27  ;;  %v578_v43 = vrot.slane %v562_v23, 6  ;;  %v1176_v44 = vadd.f32 %v1087_v17, %v404_v29 }
 0x16d   :  { %v397_v45 = vmax.f32 %v395_v20, %v396_v32  ;;  %v424_v46 = vrot.slane %v423_v34, 1  ;;  %v1179_v49 = vadd.f32 %v1087_v17, %v432_v31  ;;  %v529_v54 = vmul.f32 %v1133_v15, %v1133_v15 }
 0x16e   :  { %v444_v52 = vmax.f32 %v442_v26, %v443_v37  ;;  %v436_v53 = vrot.slane %v435_v42, 2  ;;  %v506_v56 = vrot.slane %v1176_v44, 7  ;;  %v561_v57 = vmul.f32 %v1176_v44, %v1176_v44 }
 0x16f   :  { %v1187_v59 = vadd.f32 %v1087_v17, %v397_v45  ;;  %v530_v60 = vmul.f32 %v1164_v8, %v1164_v8  ;;  %v425_v0 = vmax.f32 %v423_v34, %v424_v46  ;;  %v541_v3 = vsel %vm486_vm1, %v540_v47, %v1119_v63 }
 0x170   :  { %v445_v1 = vrot.slane %v444_v52, 1  ;;  %v437_v2 = vmax.f32 %v435_v42, %v436_v53  ;;  %v576_v5 = vrot.slane %v561_v57, 7  ;;  %v543_v11 = vsel %vm489_vm4, %v542_v24, %v541_v3 }
 0x171   :  { %v507_v7 = vsel %vm486_vm1, %v506_v56, %v1187_v59  ;;  %v560_v10 = vmul.f32 %v1187_v59, %v1187_v59  ;;  %v1203_v18 = vadd.f32 %v1087_v17, %v425_v0  ;;  %v531_v39 = vmul.f32 %v1146_v28, %v1146_v28 }
 0x172   :  { %v446_v19 = vmax.f32 %v444_v52, %v445_v1  ;;  %v438_v20 = vrot.slane %v437_v2, 1  ;;  %v514_v47 = vrot.slane %v1179_v49, 3  ;;  %v509_v63 = vsel %vm489_vm4, %v508_v36, %v507_v7 }
 0x173   :  { %v545_v21 = vsel %vm492_vm5, %v544_v12, %v543_v11  ;;  %v550_v23 = vrot.slane %v530_v60, 2  ;;  %v564_v6 = vmul.f32 %v1203_v18, %v1203_v18  ;;  %v548_v27 = vrot.slane %v529_v54, 3 }
 0x174   :  { %v1215_v24 = vadd.f32 %v1087_v17, %v446_v19  ;;  %v439_v26 = vmax.f32 %v437_v2, %v438_v20  ;;  %v512_v29 = vrot.slane %v1203_v18, 4  ;;  %v547_v31 = vsel %vm495_vm6, %v546_v50, %v545_v21 }
 0x175   :  { %v565_v55 = vmul.f32 %v1179_v49, %v1179_v49  ;;  %v577_v12 = vsel %vm486_vm1, %v576_v5, %v560_v10  ;;  %v582_v32 = vrot.slane %v564_v6, 4  ;;  %v549_v36 = vsel %vm498_vm7, %v548_v27, %v547_v31 }
 0x176   :  { %v1225_v34 = vadd.f32 %v1087_v17, %v439_v26  ;;  %v552_v37 = vrot.slane %v531_v39, 1  ;;  %v511_v42 = vsel %vm492_vm5, %v510_v61, %v509_v63  ;;  %v551_v25 = vsel %vm501_vm8, %v550_v23, %v549_v36 }
 0x177   :  { %v567_v50 = vmul.f32 %v1215_v24, %v1215_v24  ;;  %v579_v45 = vsel %vm489_vm4, %v578_v43, %v577_v12  ;;  %v584_v56 = vrot.slane %v565_v55, 3  ;;  %v493_v43 = vsel %vm492_vm5, %v491_v4, %v1130_v13 }
 0x178   :  { %v516_v46 = vrot.slane %v1225_v34, 2  ;;  %v553_v52 = vsel %vm504_vm9, %v552_v37, %v551_v25  ;;  %v566_v17 = vmul.f32 %v1225_v34, %v1225_v34  ;;  %v581_v53 = vsel %vm492_vm5, %v580_v22, %v579_v45 }
 0x179   :  { %v555_v61 = vsel %vm334_vm3, %v553_v52, 0.0  ;;  %v583_v54 = vsel %vm495_vm6, %v582_v32, %v581_v53  ;;  %v518_v57 = vrot.slane %v1215_v24, 1  ;;  %v496_v62 = vsel %vm495_vm6, %v494_v38, %v493_v43 }
 0x17a   :  { %556 = vadd.xlane.f32.xlu0 %v555_v61  ;;  %v586_v60 = vrot.slane %v566_v17, 2  ;;  %v513_v22 = vsel %vm495_vm6, %v512_v29, %v511_v42  ;;  %v585_v0 = vsel %vm498_vm7, %v584_v56, %v583_v54  ;;  %v588_v1 = vrot.slane %v567_v50, 1 }
 0x17b   :  { %v499_v2 = vsel %vm498_vm7, %v497_v33, %v496_v62  ;;  %v515_v3 = vsel %vm498_vm7, %v514_v47, %v513_v22 }
 0x17c   :  { %v587_v4 = vsel %vm501_vm8, %v586_v60, %v585_v0  ;;  %v502_v13 = vsel %vm501_vm8, %v500_v35, %v499_v2  ;;  %v517_v5 = vsel %vm501_vm8, %v516_v46, %v515_v3 }
 0x17d   :  { %v589_v38 = vsel %vm504_vm9, %v588_v1, %v587_v4  ;;  %v505_v7 = vsel %vm504_vm9, %v503_v51, %v502_v13  ;;  %v519_v10 = vsel %vm504_vm9, %v518_v57, %v517_v5  ;;  %v941_v13 = vmov 1.0  }
 0x17e   :  { %v591_v33 = vsel %vm334_vm3, %v589_v38, 0.0  ;;  %522 = vst.msk [vmem:[#allocation4] sm:$0xff] %vm334_vm3, %v505_v7  ;;  %523 = vst.msk [vmem:[#allocation4 + $0x8] sm:$0xff] %vm334_vm3, %v519_v10 }
 0x17f   :  { %592 = vadd.xlane.f32.xlu1 %v591_v33 }
 0x203   :  { %v557_v35 = vpop.xlane.xlu0 %556 }
 0x204   :  { %v558_v11 = vmax.f32 %v557_v35, 1e-24 }
 0x206   :  { %890 = vrsqrt.f32 %v558_v11 }
 0x208   :  { %v593_v19 = vpop.xlane.xlu1 %592 }
 0x209   :  { %v594_v20 = vmax.f32 %v593_v19, 1e-24 }
 0x20b   :  { %892 = vrsqrt.f32 %v594_v20 }
 0x213   :  { %v891_v39 = vpop.eup %890 }
 0x214   :  { %v597_v51 = vrot.slane %v891_v39, 1  ;;  %v598_v47 = vrot.slane %v891_v39, 2  ;;  %v599_v63 = vrot.slane %v891_v39, 3  ;;  %v600_v21 = vrot.slane %v891_v39, 4 }
 0x215   :  { %v601_v23 = vrot.slane %v891_v39, 5  ;;  %v602_v6 = vrot.slane %v891_v39, 6  ;;  %v603_v26 = vrot.slane %v891_v39, 7  ;;  %v612_v29 = vmul.f32 %v891_v39, %v1101_v40 }
 0x216   :  { %v613_v31 = vmul.f32 %v597_v51, %v1093_v30  ;;  %v614_v14 = vmul.f32 %v598_v47, %v1115_v58  ;;  %v615_v55 = vmul.f32 %v599_v63, %v1105_v48  ;;  %v616_v58 = vmul.f32 %v600_v21, %v1136_v16 }
 0x217   :  { %v617_v48 = vmul.f32 %v601_v23, %v1133_v15 }
 0x218   :  { %v893_v27 = vpop.eup %892 }
 0x219   :  { %v621_v12 = vrot.slane %v893_v27, 1  ;;  %v622_v32 = vrot.slane %v893_v27, 2  ;;  %v623_v36 = vrot.slane %v893_v27, 3  ;;  %v624_v37 = vrot.slane %v893_v27, 4 }
 0x21a   :  { %v625_v42 = vrot.slane %v893_v27, 5  ;;  %v626_v25 = vrot.slane %v893_v27, 6  ;;  %v627_v50 = vrot.slane %v893_v27, 7  ;;  %v636_v45 = vmul.f32 %v893_v27, %v1187_v59 }
 0x21b   :  { %v637_v46 = vmul.f32 %v621_v12, %v1176_v44  ;;  %v638_v52 = vmul.f32 %v622_v32, %v1167_v9  ;;  %v639_v40 = vmul.f32 %v623_v36, %v1152_v41  ;;  %v640_v30 = vmul.f32 %v624_v37, %v1203_v18 }
 0x21c   :  { %v641_v17 = vmul.f32 %v625_v42, %v1179_v49  ;;  %v642_v53 = vmul.f32 %v626_v25, %v1225_v34  ;;  %v643_v61 = vmul.f32 %v627_v50, %v1215_v24  ;;  %v618_v44 = vmul.f32 %v602_v6, %v1164_v8 }
 0x21d   :  { %v645_v54 = vmul.f32 %v637_v46, %v613_v31  ;;  %v646_v59 = vmul.f32 %v638_v52, %v614_v14  ;;  %v647_v56 = vmul.f32 %v639_v40, %v615_v55  ;;  %v619_v9 = vmul.f32 %v603_v26, %v1146_v28 }
 0x21e   :  { %v648_v41 = vmul.f32 %v640_v30, %v616_v58  ;;  %v644_v43 = vmul.f32 %v636_v45, %v612_v29  ;;  %v649_v18 = vmul.f32 %v641_v17, %v617_v48  ;;  %v650_v60 = vmul.f32 %v642_v53, %v618_v44 }
 0x21f   :  { %v660_v57 = vrot.slane %v645_v54, 7  ;;  %v662_v16 = vrot.slane %v646_v59, 6  ;;  %v651_v15 = vmul.f32 %v643_v61, %v619_v9  ;;  %v664_v62 = vrot.slane %v647_v56, 5 }
 0x220   :  { %v666_v24 = vrot.slane %v648_v41, 4  ;;  %v668_v0 = vrot.slane %v649_v18, 3  ;;  %v670_v1 = vrot.slane %v650_v60, 2 }
 0x221   :  { %v661_v49 = vsel %vm486_vm1, %v660_v57, %v644_v43  ;;  %v672_v2 = vrot.slane %v651_v15, 1 }
 0x222   :  { %v663_v34 = vsel %vm489_vm4, %v662_v16, %v661_v49 }
 0x223   :  { %v665_v22 = vsel %vm492_vm5, %v664_v62, %v663_v34 }
 0x224   :  { %v667_v8 = vsel %vm495_vm6, %v666_v24, %v665_v22 }
 0x225   :  { %v669_v28 = vsel %vm498_vm7, %v668_v0, %v667_v8 }
 0x226   :  { %v671_v3 = vsel %vm501_vm8, %v670_v1, %v669_v28 }
 0x227   :  { %v673_v4 = vsel %vm504_vm9, %v672_v2, %v671_v3 }
 0x228   :  { %870 = vmatpush3.xpose.msk.msra.mxu1 %vm334_vm3, %v673_v4 }
 0x22b   :  { %872 = vmatmul.mubr.msk.f32.vlgmr.msra.gmra.mxu1 %vm334_vm3, %v941_v13 }
 0x22c   :  { %905 = shalt.err (!%p902_p4)
}
 0x22d   :  { %s943_s29 = smov 128   ;;  %s944_s30 = smov 8   ;;  %vm750_vm11 = vcmask 57344  }
 0x22e   :  { %773 = dma.vmem_to_hbm [thread:$0]  %s768_s27, 256, %s1307_s4, [#allocation5], %s943_s29, %s943_s29, %s944_s30  }
 0x22f   :  { %s945_s7 = smov [#allocation2]  }
 0x230   :  { %s758_s8 = sshll.u32 %s945_s7, 4  ;;  %s759_s8 = int_to_ptr.vmem [resolvable:$true] %s758_s8 }
 0x231   :  { %s914_s9 = scalar_lea.vmem %s759_s8, 16  ;;  %s918_s10 = scalar_lea.vmem %s759_s8, 32 }
 0x232   :  { %p915_p5 = scmp.ne.s32.totalorder %s759_s8, %s914_s9  ;;  %p919_p6 = scmp.lt.s32.totalorder %s759_s8, %s759_s8 }
 0x233   :  { %p920_p7 = scmp.lt.s32.totalorder %s918_s10, %s914_s9 }
 0x235   :  { %p921_p8 = por %p920_p7, %p919_p6 }
 0x237   :  { %p922_p9 = pnand %p921_p8, %p915_p5 }
 0x2eb   :  { %v745_v5 = vpop.f32.mrf.mxu1 }
 0x2ec   :  { %v749_v38 = vsub.f32 1.0, %v745_v5 }
 0x2ed   :  { %v873_v7 = vpop.f32.mrf.mxu1 }
 0x2ee   :  { %751 = vst.msk [vmem:[#allocation2] sm:$0x1] %vm750_vm11, %v749_v38 }
 0x2ef   :  { %925 = shalt.err (!%p922_p9)
}
 0x2f0   :  { %761 = dma.vmem_to_hbm [thread:$0]  %s759_s8, 16, %s1306_s3, [#allocation3]  }
 0x2f1   :  { %934 = dma.done.wait [#allocation3], 16  }
 0x2f2   :  { %935 = vsyncadd [#allocation3], 4294967280 }
 0x2f3   :  { %936 = dma.done.wait [#allocation5], 256  }
 0x2f4   :  { %937 = vsyncadd [#allocation5], 4294967040 }
 0x2f5   :  { %780 = vsyncpa [#allocation3], 1 }
 0x2f6   :  { %781 = vsyncpa [#allocation5], 1 }

</bundles_post_ra>
